<compile_context>
chip_gen: v7x
topology: tpu7x:2x2x1
jax: 0.10.0
libtpu: 0.0.40
codegen_flags: <defaults>
</compile_context>

<pallas_src>
import functools

import jax
import jax.numpy as jnp
from jax.experimental import pallas as pl
from jax.experimental.pallas import tpu as pltpu


def _round_up(x, m):
    return (x + m - 1) // m * m


def _epilogue_dtype():
    """bf16 elementwise epilogue on v6e/v7x (bf16 VPU); f32 on v5e / unknown."""
    try:
        kind = jax.devices()[0].device_kind.lower()
    except Exception:
        return jnp.float32
    if "v6" in kind or "v7" in kind:
        return jnp.bfloat16
    return jnp.float32


def _choose_tb(batch):
    """Row tile: multiple of 16, capped VMEM-safe; >=2 grid steps for v7x."""
    tb_cap = 1024  # fits comfortably under v5e's ~16 MiB scoped-VMEM default
    if batch <= 32:
        return _round_up(batch, 16)
    half = _round_up((batch + 1) // 2, 16)  # at least 2 steps -> both TCs on v7x
    return min(tb_cap, half)


def mlp_kernel(alpha_ref,                 # SMEM (3,) f32 PReLU alphas
               x_ref,                     # (TB, IN) f32  (native, un-padded K)
               w1s_ref, b1s_ref,          # (IN, HID_P+OUT) bf16, (1, HID_P+OUT) f32
               w2_ref, b2_ref,            # (HID_P, HID_P) bf16,  (1, HID_P) f32
               w3_ref, b3_ref,            # (HID_P, OUT) bf16,    (1, OUT) f32
               o_ref,                     # (TB, OUT) f32
               *, ep_dtype):
    hid = w2_ref.shape[0]                 # static (padded hidden width)
    a1 = alpha_ref[0].astype(ep_dtype)
    a2 = alpha_ref[1].astype(ep_dtype)
    a3 = alpha_ref[2].astype(ep_dtype)

    # Cast to bf16 in-register (no separate XLA pad/cast pass over HBM).
    x = x_ref[...].astype(jnp.bfloat16)

    # Fused layer-1 + shortcut: one MXU pass over the concatenated weights.
    xw = jnp.dot(x, w1s_ref[...], preferred_element_type=jnp.float32) + b1s_ref[...]
    h = xw[:, :hid].astype(ep_dtype)          # 128-aligned split
    s = xw[:, hid:].astype(ep_dtype)          # shortcut, live across layers 2-3

    # PReLU as a single compare+select.
    h = jnp.where(h >= 0.0, h, a1 * h)
    h = (jnp.dot(h.astype(jnp.bfloat16), w2_ref[...],
                 preferred_element_type=jnp.float32) + b2_ref[...]).astype(ep_dtype)
    h = jnp.where(h >= 0.0, h, a2 * h)
    h = (jnp.dot(h.astype(jnp.bfloat16), w3_ref[...],
                 preferred_element_type=jnp.float32) + b3_ref[...]).astype(ep_dtype)
    h = jnp.where(h >= 0.0, h, a3 * h)

    o_ref[...] = (h + s).astype(o_ref.dtype)


def prepare_params(params, hidden_channels):
    """One-time transform: pad ONLY the hidden dim to 128 (keeps the xw split
    lane-aligned), concat layer1+shortcut along the output dim, cast weights to
    bf16 (biases stay f32). K (in_channels) and out_channels stay un-padded."""
    (w1, b1, a1, w2, b2, a2, w3, b3, a3, ws, bs) = params
    hid_p = _round_up(hidden_channels, 128)

    def padcols(a, cols):
        return jnp.pad(a, ((0, 0), (0, cols - a.shape[1])))

    def padrows(a, rows):
        return jnp.pad(a, ((0, rows - a.shape[0]), (0, 0)))

    w1s = jnp.concatenate([padcols(w1, hid_p), ws], axis=1).astype(jnp.bfloat16)
    b1s = jnp.concatenate([padcols(b1, hid_p), bs], axis=1).astype(jnp.float32)
    w2p = padrows(padcols(w2, hid_p), hid_p).astype(jnp.bfloat16)
    b2p = padcols(b2, hid_p).astype(jnp.float32)
    w3p = padrows(w3, hid_p).astype(jnp.bfloat16)
    b3p = b3.astype(jnp.float32)
    alphas = jnp.concatenate([a1, a2, a3]).astype(jnp.float32)  # (3,)

    return dict(w1s=w1s, b1s=b1s, w2=w2p, b2=b2p, w3=w3p, b3=b3p, alphas=alphas)


@jax.jit
def mlp_forward(x, prepared):
    w1s = prepared["w1s"]
    b1s = prepared["b1s"]
    w2 = prepared["w2"]
    b2 = prepared["b2"]
    w3 = prepared["w3"]
    b3 = prepared["b3"]
    alphas = prepared["alphas"]

    B, in_c = x.shape                     # static at trace time
    cat_p = w1s.shape[1]
    hid_p = w2.shape[0]
    out_c = w3.shape[1]
    ep_dtype = _epilogue_dtype()          # Python-level, static

    TB = _choose_tb(B)
    grid_n = pl.cdiv(B, TB)
    B_pad = grid_n * TB
    x_in = x if B_pad == B else jnp.pad(x, ((0, B_pad - B), (0, 0)))

    out = pl.pallas_call(
        functools.partial(mlp_kernel, ep_dtype=ep_dtype),
        out_shape=jax.ShapeDtypeStruct((B_pad, out_c), jnp.float32),
        grid=(grid_n,),
        in_specs=[
            pl.BlockSpec(memory_space=pltpu.SMEM),            # alphas (whole, SMEM)
            pl.BlockSpec((TB, in_c), lambda i: (i, 0)),        # x rows tiled (native K)
            pl.BlockSpec((in_c, cat_p), lambda i: (0, 0)),     # fused w1|ws (resident)
            pl.BlockSpec((1, cat_p), lambda i: (0, 0)),        # fused b1|bs
            pl.BlockSpec((hid_p, hid_p), lambda i: (0, 0)),    # w2
            pl.BlockSpec((1, hid_p), lambda i: (0, 0)),        # b2
            pl.BlockSpec((hid_p, out_c), lambda i: (0, 0)),    # w3
            pl.BlockSpec((1, out_c), lambda i: (0, 0)),        # b3
        ],
        out_specs=pl.BlockSpec((TB, out_c), lambda i: (i, 0)), # un-padded out width
        compiler_params=pltpu.CompilerParams(
            dimension_semantics=("parallel",)),
    )(alphas, x_in, w1s, b1s, w2, b2, w3, b3)

    return out if B_pad == B else out[:B]


def init_params(key, in_channels, hidden_channels, out_channels):
    ks = jax.random.split(key, 8)
    scale = 0.1
    # weights stored as (in, out) so the kernel computes x @ W
    w1 = jax.random.normal(ks[0], (in_channels, hidden_channels), jnp.float32) * scale
    b1 = jax.random.normal(ks[1], (1, hidden_channels), jnp.float32) * scale
    w2 = jax.random.normal(ks[2], (hidden_channels, hidden_channels), jnp.float32) * scale
    b2 = jax.random.normal(ks[3], (1, hidden_channels), jnp.float32) * scale
    w3 = jax.random.normal(ks[4], (hidden_channels, out_channels), jnp.float32) * scale
    b3 = jax.random.normal(ks[5], (1, out_channels), jnp.float32) * scale
    ws = jax.random.normal(ks[6], (in_channels, out_channels), jnp.float32) * scale
    bs = jax.random.normal(ks[7], (1, out_channels), jnp.float32) * scale
    # PyTorch PReLU default: single shared alpha = 0.25
    a1 = jnp.array([0.25], jnp.float32)
    a2 = jnp.array([0.25], jnp.float32)
    a3 = jnp.array([0.25], jnp.float32)
    return (w1, b1, a1, w2, b2, a2, w3, b3, a3, ws, bs)


def mlp_reference(x, params):
    (w1, b1, a1, w2, b2, a2, w3, b3, a3, ws, bs) = params

    def prelu(v, a):
        return jnp.where(v >= 0.0, v, a * v)

    h = prelu(x @ w1 + b1, a1[0])
    h = prelu(h @ w2 + b2, a2[0])
    h = prelu(h @ w3 + b3, a3[0])
    return h + (x @ ws + bs)


if __name__ == "__main__":
    key = jax.random.PRNGKey(0)
    kx, kp = jax.random.split(key)

    batch = 8
    in_channels = 32
    hidden_channels = 64
    out_channels = 32

    x = jax.random.normal(kx, (batch, in_channels), jnp.float32)
    params = init_params(kp, in_channels, hidden_channels, out_channels)
    prepared = prepare_params(params, hidden_channels)

    out = mlp_forward(x, prepared)
    jax.block_until_ready(out)

    ref = mlp_reference(x, params)
    assert out.shape == (batch, out_channels), out.shape
    # bf16 operands w/ f32 accumulation: loosen tolerance vs the f32 reference.
    assert jnp.allclose(out, ref, atol=5e-2, rtol=5e-2), float(jnp.max(jnp.abs(out - ref)))

    print("KERNEL_OK")
</pallas_src>

<mosaic_0001>
module attributes {stable_mosaic.version = 11 : i64} {
  func.func @mlp_kernel(%arg0: i32, %arg1: memref<3xf32, #tpu.memory_space<smem>>, %arg2: memref<16x32xf32, #tpu.memory_space<vmem>>, %arg3: memref<32x160xbf16, #tpu.memory_space<vmem>>, %arg4: memref<1x160xf32, #tpu.memory_space<vmem>>, %arg5: memref<128x128xbf16, #tpu.memory_space<vmem>>, %arg6: memref<1x128xf32, #tpu.memory_space<vmem>>, %arg7: memref<128x32xbf16, #tpu.memory_space<vmem>>, %arg8: memref<1x32xf32, #tpu.memory_space<vmem>>, %arg9: memref<16x32xf32, #tpu.memory_space<vmem>>) attributes {dimension_semantics = [#tpu.dimension_semantics<parallel>], iteration_bounds = array<i64: 1>, scalar_prefetch = 0 : i64, scratch_operands = 0 : i64, tpu.core_type = #tpu.core_type<tc>, window_params = [{transform_indices = @transform_0, window_bounds = array<i64: 3>}, {transform_indices = @transform_1, window_bounds = array<i64: 16, 32>}, {pipeline_mode = #tpu.pipeline_mode<synchronous>, transform_indices = @transform_2, window_bounds = array<i64: 32, 160>}, {pipeline_mode = #tpu.pipeline_mode<synchronous>, transform_indices = @transform_3, window_bounds = array<i64: 1, 160>}, {pipeline_mode = #tpu.pipeline_mode<synchronous>, transform_indices = @transform_4, window_bounds = array<i64: 128, 128>}, {pipeline_mode = #tpu.pipeline_mode<synchronous>, transform_indices = @transform_5, window_bounds = array<i64: 1, 128>}, {pipeline_mode = #tpu.pipeline_mode<synchronous>, transform_indices = @transform_6, window_bounds = array<i64: 128, 32>}, {pipeline_mode = #tpu.pipeline_mode<synchronous>, transform_indices = @transform_7, window_bounds = array<i64: 1, 32>}, {transform_indices = @transform_8, window_bounds = array<i64: 16, 32>}]} {
    %c0 = arith.constant 0 : index
    %0 = memref.load %arg1[%c0] : memref<3xf32, #tpu.memory_space<smem>>
    %c1 = arith.constant 1 : index
    %1 = memref.load %arg1[%c1] : memref<3xf32, #tpu.memory_space<smem>>
    %c2 = arith.constant 2 : index
    %2 = memref.load %arg1[%c2] : memref<3xf32, #tpu.memory_space<smem>>
    %c0_0 = arith.constant 0 : index
    %c0_1 = arith.constant 0 : index
    %3 = vector.load %arg2[%c0_0, %c0_1] : memref<16x32xf32, #tpu.memory_space<vmem>>, vector<16x32xf32>
    %4 = arith.truncf %3 : vector<16x32xf32> to vector<16x32xbf16>
    %c0_2 = arith.constant 0 : index
    %c0_3 = arith.constant 0 : index
    %5 = vector.load %arg3[%c0_2, %c0_3] : memref<32x160xbf16, #tpu.memory_space<vmem>>, vector<32x160xbf16>
    %cst = arith.constant dense<0.000000e+00> : vector<16x160xf32>
    %6 = tpu.matmul %4, %5, %cst {dimension_numbers = #tpu.dot_dimension_numbers<[1], [0], [0], [1], [0, 0, 1, 1], [], []>} : vector<16x32xbf16>, vector<32x160xbf16>, vector<16x160xf32> -> vector<16x160xf32>
    %c0_4 = arith.constant 0 : index
    %c0_5 = arith.constant 0 : index
    %7 = vector.load %arg4[%c0_4, %c0_5] : memref<1x160xf32, #tpu.memory_space<vmem>>, vector<1x160xf32>
    %8 = vector.broadcast %7 : vector<1x160xf32> to vector<16x160xf32>
    %9 = arith.addf %6, %8 : vector<16x160xf32>
    %10 = vector.extract_strided_slice %9 {offsets = [0, 0], sizes = [16, 128], strides = [1, 1]} : vector<16x160xf32> to vector<16x128xf32>
    %11 = vector.extract_strided_slice %9 {offsets = [0, 128], sizes = [16, 32], strides = [1, 1]} : vector<16x160xf32> to vector<16x32xf32>
    %cst_6 = arith.constant 0.000000e+00 : f32
    %12 = vector.broadcast %cst_6 : f32 to vector<16x128xf32>
    %13 = arith.cmpf oge, %10, %12 : vector<16x128xf32>
    %14 = vector.broadcast %0 : f32 to vector<16x128xf32>
    %15 = arith.mulf %14, %10 : vector<16x128xf32>
    %16 = arith.select %13, %10, %15 : vector<16x128xi1>, vector<16x128xf32>
    %17 = arith.truncf %16 : vector<16x128xf32> to vector<16x128xbf16>
    %c0_7 = arith.constant 0 : index
    %c0_8 = arith.constant 0 : index
    %18 = vector.load %arg5[%c0_7, %c0_8] : memref<128x128xbf16, #tpu.memory_space<vmem>>, vector<128x128xbf16>
    %cst_9 = arith.constant dense<0.000000e+00> : vector<16x128xf32>
    %19 = tpu.matmul %17, %18, %cst_9 {dimension_numbers = #tpu.dot_dimension_numbers<[1], [0], [0], [1], [0, 0, 1, 1], [], []>} : vector<16x128xbf16>, vector<128x128xbf16>, vector<16x128xf32> -> vector<16x128xf32>
    %c0_10 = arith.constant 0 : index
    %c0_11 = arith.constant 0 : index
    %20 = vector.load %arg6[%c0_10, %c0_11] : memref<1x128xf32, #tpu.memory_space<vmem>>, vector<1x128xf32>
    %21 = vector.broadcast %20 : vector<1x128xf32> to vector<16x128xf32>
    %22 = arith.addf %19, %21 : vector<16x128xf32>
    %cst_12 = arith.constant 0.000000e+00 : f32
    %23 = vector.broadcast %cst_12 : f32 to vector<16x128xf32>
    %24 = arith.cmpf oge, %22, %23 : vector<16x128xf32>
    %25 = vector.broadcast %1 : f32 to vector<16x128xf32>
    %26 = arith.mulf %25, %22 : vector<16x128xf32>
    %27 = arith.select %24, %22, %26 : vector<16x128xi1>, vector<16x128xf32>
    %28 = arith.truncf %27 : vector<16x128xf32> to vector<16x128xbf16>
    %c0_13 = arith.constant 0 : index
    %c0_14 = arith.constant 0 : index
    %29 = vector.load %arg7[%c0_13, %c0_14] : memref<128x32xbf16, #tpu.memory_space<vmem>>, vector<128x32xbf16>
    %cst_15 = arith.constant dense<0.000000e+00> : vector<16x32xf32>
    %30 = tpu.matmul %28, %29, %cst_15 {dimension_numbers = #tpu.dot_dimension_numbers<[1], [0], [0], [1], [0, 0, 1, 1], [], []>} : vector<16x128xbf16>, vector<128x32xbf16>, vector<16x32xf32> -> vector<16x32xf32>
    %c0_16 = arith.constant 0 : index
    %c0_17 = arith.constant 0 : index
    %31 = vector.load %arg8[%c0_16, %c0_17] : memref<1x32xf32, #tpu.memory_space<vmem>>, vector<1x32xf32>
    %32 = vector.broadcast %31 : vector<1x32xf32> to vector<16x32xf32>
    %33 = arith.addf %30, %32 : vector<16x32xf32>
    %cst_18 = arith.constant 0.000000e+00 : f32
    %34 = vector.broadcast %cst_18 : f32 to vector<16x32xf32>
    %35 = arith.cmpf oge, %33, %34 : vector<16x32xf32>
    %36 = vector.broadcast %2 : f32 to vector<16x32xf32>
    %37 = arith.mulf %36, %33 : vector<16x32xf32>
    %38 = arith.select %35, %33, %37 : vector<16x32xi1>, vector<16x32xf32>
    %39 = arith.addf %38, %11 : vector<16x32xf32>
    %c0_19 = arith.constant 0 : index
    %c0_20 = arith.constant 0 : index
    %40 = vector.load %arg9[%c0_19, %c0_20] : memref<16x32xf32, #tpu.memory_space<vmem>>, vector<16x32xf32>
    tpu.vector_store %arg9[%c0_19, %c0_20], %39 {strides = array<i32>} : memref<16x32xf32, #tpu.memory_space<vmem>>, vector<16x32xf32>,
    return
  }
  func.func @transform_0(%arg0: i32) -> i32 {
    %c0_i32 = arith.constant 0 : i32
    %c0_i32_0 = arith.constant 0 : i32
    return %c0_i32 : i32
  }
  func.func @transform_1(%arg0: i32) -> (i32, i32) {
    %c0_i32 = arith.constant 0 : i32
    %c0_i32_0 = arith.constant 0 : i32
    return %arg0, %c0_i32 : i32, i32
  }
  func.func @transform_2(%arg0: i32) -> (i32, i32) {
    %c0_i32 = arith.constant 0 : i32
    %c0_i32_0 = arith.constant 0 : i32
    %c0_i32_1 = arith.constant 0 : i32
    return %c0_i32, %c0_i32_0 : i32, i32
  }
  func.func @transform_3(%arg0: i32) -> (i32, i32) {
    %c0_i32 = arith.constant 0 : i32
    %c0_i32_0 = arith.constant 0 : i32
    %c0_i32_1 = arith.constant 0 : i32
    return %c0_i32, %c0_i32_0 : i32, i32
  }
  func.func @transform_4(%arg0: i32) -> (i32, i32) {
    %c0_i32 = arith.constant 0 : i32
    %c0_i32_0 = arith.constant 0 : i32
    %c0_i32_1 = arith.constant 0 : i32
    return %c0_i32, %c0_i32_0 : i32, i32
  }
  func.func @transform_5(%arg0: i32) -> (i32, i32) {
    %c0_i32 = arith.constant 0 : i32
    %c0_i32_0 = arith.constant 0 : i32
    %c0_i32_1 = arith.constant 0 : i32
    return %c0_i32, %c0_i32_0 : i32, i32
  }
  func.func @transform_6(%arg0: i32) -> (i32, i32) {
    %c0_i32 = arith.constant 0 : i32
    %c0_i32_0 = arith.constant 0 : i32
    %c0_i32_1 = arith.constant 0 : i32
    return %c0_i32, %c0_i32_0 : i32, i32
  }
  func.func @transform_7(%arg0: i32) -> (i32, i32) {
    %c0_i32 = arith.constant 0 : i32
    %c0_i32_0 = arith.constant 0 : i32
    %c0_i32_1 = arith.constant 0 : i32
    return %c0_i32, %c0_i32_0 : i32, i32
  }
  func.func @transform_8(%arg0: i32) -> (i32, i32) {
    %c0_i32 = arith.constant 0 : i32
    %c0_i32_0 = arith.constant 0 : i32
    return %arg0, %c0_i32 : i32, i32
  }
}

</mosaic_0001>

<bundles_post_ra>
// kernel: mlp_forward.1
= control target key start
LH: loop header
LB: loop body
LE: loop exit
PB: predicated region body
PF: predicated region fallthrough
CT: control target
= control target key end

     0   :  { %13 = vsyncpa [#allocation3], 0  ;;  %s665_s0 = inlined_call_operand.vmem [shape: f32[3], index: 0, kind: input, shape index: {}]   ;;  %s666_s1 = inlined_call_operand.vmem [shape: f32[16,32], index: 1, kind: input, shape index: {}]   ;;  %s667_s2 = inlined_call_operand.vmem [shape: bf16[32,160], index: 2, kind: input, shape index: {}]   ;;  %s668_s3 = inlined_call_operand.vmem [shape: f32[1,160], index: 3, kind: input, shape index: {}]   ;;  %s669_s4 = inlined_call_operand.vmem [shape: bf16[128,128], index: 4, kind: input, shape index: {}]   ;;  %s670_s5 = inlined_call_operand.vmem [shape: f32[1,128], index: 5, kind: input, shape index: {}]   ;;  %s671_s6 = inlined_call_operand.vmem [shape: bf16[128,32], index: 6, kind: input, shape index: {}]   ;;  %s672_s7 = inlined_call_operand.vmem [shape: f32[1,32], index: 7, kind: input, shape index: {}]   ;;  %s673_s8 = inlined_call_operand.vmem [shape: f32[16,32], index: 8, kind: output, shape index: {}]  }
   0x1   :  { %s20_s29 = sshll.u32 %s665_s0, 4  ;;  %s21_s29 = int_to_ptr.vmem [resolvable:$true] %s20_s29 }
   0x2   :  { %s497_s30 = scalar_lea.vmem %s21_s29, 16  ;;  %p502_p1 = scmp.lt.s32.totalorder %s21_s29, %s21_s29 }
   0x3   :  { %p498_p0 = scmp.ne.s32.totalorder %s21_s29, %s497_s30  ;;  %p503_p2 = scmp.lt.s32.totalorder %s497_s30, %s497_s30 }
   0x5   :  { %p504_p3 = por %p503_p2, %p502_p1 }
   0x7   :  { %p505_p4 = pnand %p504_p3, %p498_p0 }
   0x9   :  { %508 = shalt.err (!%p505_p4)
}
   0xa   :  { %s511_s9 = smov [#allocation2]  }
   0xb   :  { %23 = dma.vmem_to_smem %s21_s29, 16, %s511_s9, [#allocation3]  }
   0xc   :  { %509 = dma.done.wait [#allocation3], 16  }
   0xd   :  { %510 = vsyncadd [#allocation3], 4294967280 }
   0xe   :  { %41 = sfence }
   0xf   :  { %v475_v0 = vld [vmem:[%s667_s2 + $0x4] ss:$8 sps:$4 sm:$0xff]   ;;  %v477_v1 = vld [vmem:[%s667_s2] ss:$8 sps:$4 sm:$0xff]   ;;  %v512_v2 = vmov 0   ;;  %v513_v6 = vmov 0.0   ;;  %v55_v23 = vlaneseq }
  0x10   :  { %121 = vmatprep.mubr.bf16.mxu0 %v512_v2  ;;  %89 = vmatprep.subr.bf16.mxu0 %v475_v0  ;;  %v478_v3 = vld [vmem:[%s667_s2 + $0x14] ss:$8 sps:$4 sm:$0xff]   ;;  %v480_v4 = vld [vmem:[%s667_s2 + $0x10] ss:$8 sps:$4 sm:$0xff]   ;;  %v46_v5 = vld [vmem:[%s666_s1] sm:$0xff]  ;;  %vm85_vm0 = vcmask 261120  }
  0x11   :  { %431 = vmatprep.subr.bf16.mxu1 %v513_v6  ;;  %90 = vmatpush1.bf16.msra.mxu0 %v477_v1  ;;  %v47_v7 = vld [vmem:[%s666_s1 + $0x8] sm:$0xff]  ;;  %v481_v8 = vld [vmem:[%s669_s4] sm:$0xff]   ;;  %v483_v11 = vld [vmem:[%s669_s4 + $0x10] sm:$0xff]   ;;  %vm514_vm1 = vmmov 0   ;;  %v56_v24 = vshrl.u32 %v55_v23, 7  ;;  %s43_s2 = sld [smem:[#allocation2]] }
  0x12   :  { %91 = vmatprep.subr.bf16.mxu0 %v478_v3  ;;  %v48_v9 = vpack.c.bf16 %v47_v7, %v46_v5  ;;  %432 = vmatpush3.bf16.msra.mxu1 %v481_v8  ;;  %v482_v10 = vld [vmem:[%s669_s4 + $0x8] sm:$0xff]   ;;  %v484_v12 = vld [vmem:[%s669_s4 + $0x18] sm:$0xff]   ;;  %v485_v13 = vld [vmem:[%s669_s4 + $0x20] sm:$0xff]   ;;  %s388_s27 = sld [smem:[#allocation2 + $0x1]] }
  0x13   :  { %433 = vmatprep.subr.bf16.mxu1 %v513_v6  ;;  %v486_v14 = vld [vmem:[%s669_s4 + $0x28] sm:$0xff]   ;;  %v487_v15 = vld [vmem:[%s669_s4 + $0x30] sm:$0xff]   ;;  %v488_v16 = vld [vmem:[%s669_s4 + $0x38] sm:$0xff]   ;;  %447 = vmatprep.mubr.msk.bf16.mxu1 %vm514_vm1, %v513_v6  ;;  %v57_v25 = vsub.s32 0, %v56_v24  ;;  %v61_v55 = vsub.s32 1, %v56_v24 }
  0x14   :  { %v489_v17 = vld [vmem:[%s671_s6] sm:$0xff]   ;;  %v490_v18 = vld [vmem:[%s671_s6 + $0x8] sm:$0xff]   ;;  %v491_v19 = vld [vmem:[%s671_s6 + $0x10] sm:$0xff]  }
  0x15   :  { %92 = vmatpush1.bf16.msra.mxu0 %v480_v4  ;;  %v492_v20 = vld [vmem:[%s671_s6 + $0x18] sm:$0xff]   ;;  %v493_v21 = vld [vmem:[%s671_s6 + $0x20] sm:$0xff]   ;;  %v494_v22 = vld [vmem:[%s671_s6 + $0x28] sm:$0xff]  }
  0x16   :  { %451 = vmatprep.subr.bf16.mxu0 %v513_v6  ;;  %434 = vmatpush3.bf16.msra.mxu1 %v482_v10  ;;  %v53_v26 = vld [vmem:[%s668_s3] sm:$0x3]  ;;  %v495_v40 = vld [vmem:[%s671_s6 + $0x30] sm:$0xff]   ;;  %v496_v41 = vld [vmem:[%s671_s6 + $0x38] sm:$0xff]   ;;  %s389_s6 = sld [smem:[#allocation2 + $0x2]] }
  0x17   :  { %435 = vmatprep.subr.bf16.mxu1 %v513_v6  ;;  %v58_v27 = vrot.slane %v53_v26, %v57_v25  ;;  %v134_v29 = vstv %s43_s2  ;;  %v395_v42 = vld [vmem:[%s670_s5] ss:$0 sm:$0xff]  ;;  %v62_v57 = vrot.slane %v53_v26, %v61_v55 }
  0x18   :  { %394 = vmatmul.mubr.msk.bf16.vlgmr.msra.gmra.mrb[0].mxu0 %vm85_vm0, %v48_v9  ;;  %v254_v44 = vstv %s388_s27  ;;  %v404_v56 = vld [vmem:[%s672_s7] ss:$0 sm:$0xff] }
  0x19   :  { %467 = vmatprep.mubr.msk.bf16.mxu0 %vm514_vm1, %v513_v6  ;;  %452 = vmatpush3.bf16.msra.mxu0 %v489_v17 }
  0x1a   :  { %436 = vmatpush3.bf16.msra.mxu1 %v483_v11  ;;  %453 = vmatprep.subr.bf16.mxu0 %v513_v6 }
  0x1b   :  { %437 = vmatprep.subr.bf16.mxu1 %v513_v6 }
  0x1c   :  { %v374_v59 = vstv %s389_s6 }
  0x1d   :  { %454 = vmatpush3.bf16.msra.mxu0 %v490_v18 }
  0x1e   :  { %438 = vmatpush3.bf16.msra.mxu1 %v484_v12  ;;  %455 = vmatprep.subr.bf16.mxu0 %v513_v6 }
  0x1f   :  { %439 = vmatprep.subr.bf16.mxu1 %v513_v6 }
  0x21   :  { %456 = vmatpush3.bf16.msra.mxu0 %v491_v19 }
  0x22   :  { %440 = vmatpush3.bf16.msra.mxu1 %v485_v13  ;;  %457 = vmatprep.subr.bf16.mxu0 %v513_v6 }
  0x23   :  { %441 = vmatprep.subr.bf16.mxu1 %v513_v6 }
  0x25   :  { %458 = vmatpush3.bf16.msra.mxu0 %v492_v20 }
  0x26   :  { %442 = vmatpush3.bf16.msra.mxu1 %v486_v14  ;;  %459 = vmatprep.subr.bf16.mxu0 %v513_v6 }
  0x27   :  { %443 = vmatprep.subr.bf16.mxu1 %v513_v6 }
  0x29   :  { %460 = vmatpush3.bf16.msra.mxu0 %v493_v21 }
  0x2a   :  { %444 = vmatpush3.bf16.msra.mxu1 %v487_v15  ;;  %461 = vmatprep.subr.bf16.mxu0 %v513_v6 }
  0x2b   :  { %445 = vmatprep.subr.bf16.mxu1 %v513_v6 }
  0x2d   :  { %462 = vmatpush3.bf16.msra.mxu0 %v494_v22 }
  0x2e   :  { %446 = vmatpush3.bf16.msra.mxu1 %v488_v16  ;;  %463 = vmatprep.subr.bf16.mxu0 %v513_v6 }
  0x31   :  { %464 = vmatpush3.bf16.msra.mxu0 %v495_v40 }
  0x32   :  { %465 = vmatprep.subr.bf16.mxu0 %v513_v6 }
  0x35   :  { %466 = vmatpush3.bf16.msra.mxu0 %v496_v41 }
  0xeb   :  { %v123_v28 = vpop.f32.mrb[0].mxu0 }
  0xec   :  { %v124_v30 = vadd.f32 %v123_v28, %v58_v27  ;;  %v125_v31 = vpop.f32.mrb[1].mxu0 }
  0xed   :  { %v127_v32 = vpop.f32.mrb[2].mxu0  ;;  %v126_v2 = vadd.f32 %v125_v31, %v62_v57 }
  0xee   :  { %v135_v33 = vmul.f32 %v134_v29, %v124_v30  ;;  %v128_v34 = vadd.f32 %v127_v32, %v58_v27  ;;  %v129_v35 = vpop.f32.mrb[3].mxu0  ;;  %vm132_vm2 = vcmp.ge.f32.partialorder %v124_v30, 0.0 }
  0xef   :  { %v130_v5 = vadd.f32 %v129_v35, %v62_v57 }
  0xf0   :  { %vm133_vm3 = vcmp.ge.f32.partialorder %v128_v34, 0.0  ;;  %v136_v36 = vmul.f32 %v134_v29, %v128_v34  ;;  %v137_v37 = vsel %vm132_vm2, %v124_v30, %v135_v33 }
  0xf2   :  { %v138_v38 = vsel %vm133_vm3, %v128_v34, %v136_v36 }
  0xf3   :  { %v139_v39 = vpack.c.bf16 %v138_v38, %v137_v37 }
  0xf5   :  { %448 = vmatmul.mubr.bf16.vlgmr.msra.gmra.mrb[0].mxu1 %v139_v39 }
 0x1c8   :  { %v245_v43 = vpop.f32.mrb[0].mxu1 }
 0x1c9   :  { %v246_v45 = vadd.f32 %v395_v42, %v245_v43  ;;  %v449_v46 = vpop.f32.mrb[1].mxu1 }
 0x1ca   :  { %v248_v47 = vpop.f32.mrb[2].mxu1 }
 0x1cb   :  { %v255_v48 = vmul.f32 %v254_v44, %v246_v45  ;;  %v249_v49 = vadd.f32 %v395_v42, %v248_v47  ;;  %v450_v50 = vpop.f32.mrb[3].mxu1  ;;  %vm252_vm4 = vcmp.ge.f32.partialorder %v246_v45, 0.0 }
 0x1cd   :  { %vm253_vm5 = vcmp.ge.f32.partialorder %v249_v49, 0.0  ;;  %v256_v51 = vmul.f32 %v254_v44, %v249_v49  ;;  %v257_v52 = vsel %vm252_vm4, %v246_v45, %v255_v48 }
 0x1cf   :  { %v258_v53 = vsel %vm253_vm5, %v249_v49, %v256_v51 }
 0x1d0   :  { %v259_v54 = vpack.c.bf16 %v258_v53, %v257_v52 }
 0x1d2   :  { %468 = vmatmul.mubr.bf16.vlgmr.msra.gmra.mrb[4].mxu0 %v259_v54 }
 0x2a5   :  { %v365_v58 = vpop.f32.mrb[4].mxu0 }
 0x2a6   :  { %v366_v60 = vadd.f32 %v404_v56, %v365_v58  ;;  %v469_v61 = vpop.f32.mrb[5].mxu0 }
 0x2a7   :  { %v368_v62 = vpop.f32.mrb[6].mxu0 }
 0x2a8   :  { %vm372_vm6 = vcmp.ge.f32.partialorder %v366_v60, 0.0  ;;  %v375_v63 = vmul.f32 %v374_v59, %v366_v60  ;;  %v369_v0 = vadd.f32 %v404_v56, %v368_v62  ;;  %v470_v1 = vpop.f32.mrb[7].mxu0 }
 0x2aa   :  { %v377_v3 = vsel %vm372_vm6, %v366_v60, %v375_v63  ;;  %vm373_vm7 = vcmp.ge.f32.partialorder %v369_v0, 0.0  ;;  %v376_v4 = vmul.f32 %v374_v59, %v369_v0 }
 0x2ab   :  { %v379_v6 = vadd.f32 %v377_v3, %v126_v2 }
 0x2ac   :  { %v378_v7 = vsel %vm373_vm7, %v369_v0, %v376_v4 }
 0x2ad   :  { %381 = vst.msk [vmem:[%s673_s8] sm:$0xff] %vm85_vm0, %v379_v6  ;;  %v380_v8 = vadd.f32 %v378_v7, %v130_v5 }
 0x2af   :  { %382 = vst.msk [vmem:[%s673_s8 + $0x8] sm:$0xff] %vm85_vm0, %v380_v8 }
 0x2b0   :  { %387 = vsyncpa [#allocation3], 1 }

</bundles_post_ra>
